<compile_context>
chip_gen: v7x
topology: tpu7x:2x2x1
jax: 0.10.0
libtpu: 0.0.40
codegen_flags: <defaults>
</compile_context>

<pallas_src>
import jax
import jax.numpy as jnp
from jax.experimental import pallas as pl
from jax.experimental.pallas import tpu as pltpu

_SUBLANE = 8
_LANE = 128


def rnn_classifier_kernel(x2d_ref, wih_ref, bsum_ref, whh_ref, wfc_ref,
                          bfc_ref, out_ref):
    """Whole recurrence + classifier head in one kernel invocation.

    x2d_ref : (seq_len*bpad, input_size)  matmul dtype (bf16 by default)
    wih_ref : (input_size, hidden)        matmul dtype  (= W_ih^T)
    bsum_ref: (1, hidden)                 f32           (= b_ih + b_hh)
    whh_ref : (hidden, hidden)            matmul dtype  (= W_hh^T)
    wfc_ref : (hidden, cpad)              f32           (= W_fc^T, lane-padded)
    bfc_ref : (1, cpad)                   f32
    out_ref : (bpad, cpad)                f32
    """
    bpad = out_ref.shape[0]
    hidden = whh_ref.shape[0]
    seq_len = x2d_ref.shape[0] // bpad
    mm_dtype = whh_ref.dtype

    # ---- Phase 1: batched input projection for the entire sequence ---------
    # One large MXU matmul instead of seq_len tiny ones inside the recurrence;
    # both recurrence biases are already folded into bsum.
    xproj = (
        jnp.dot(x2d_ref[...], wih_ref[...],
                preferred_element_type=jnp.float32)
        + bsum_ref[...]
    )  # (seq_len*bpad, hidden) f32

    # ---- Phase 2: recurrence, fully unrolled, h kept in vregs --------------
    whh = whh_ref[...]                       # load recurrent weights once
    # t = 0: h_prev == 0, so h @ W_hh^T == 0 -> skip that matmul.
    h = jnp.tanh(xproj[:bpad, :])            # (bpad, hidden) f32
    for t in range(1, seq_len):
        pre = (
            jnp.dot(h.astype(mm_dtype), whh,
                    preferred_element_type=jnp.float32)
            + xproj[t * bpad:(t + 1) * bpad, :]
        )
        h = jnp.tanh(pre)

    # ---- classifier head on the final hidden state (lane-dense output) -----
    out_ref[...] = (
        jnp.dot(h, wfc_ref[...], preferred_element_type=jnp.float32)
        + bfc_ref[...]
    )


def rnn_classifier_forward(x, params, matmul_dtype=jnp.bfloat16):
    """x: (seq_len, batch, input_size) f32 -> (batch, classes) f32."""
    seq_len, batch, input_size = x.shape
    w_ih, b_ih, w_hh, b_hh, w_fc, b_fc = params
    hidden = w_hh.shape[0]
    classes = w_fc.shape[0]

    bpad = ((batch + _SUBLANE - 1) // _SUBLANE) * _SUBLANE     # sublane-align
    cpad = ((classes + _LANE - 1) // _LANE) * _LANE            # lane-dense out

    # ---- wrapper-side layout plumbing (pads / casts / reshapes only) -------
    x_p = jnp.pad(x, ((0, 0), (0, bpad - batch), (0, 0)))
    x2d = x_p.reshape(seq_len * bpad, input_size).astype(matmul_dtype)
    wih_t = w_ih.T.astype(matmul_dtype)                         # (in, hidden)
    whh_t = w_hh.T.astype(matmul_dtype)                         # (hid, hidden)
    bsum = (b_ih + b_hh).reshape(1, hidden).astype(jnp.float32) # folded biases
    wfc_t = jnp.pad(w_fc.T, ((0, 0), (0, cpad - classes))).astype(jnp.float32)
    bfc_p = jnp.pad(b_fc, (0, cpad - classes)).reshape(1, cpad).astype(
        jnp.float32)

    vmem = pl.BlockSpec(memory_space=pltpu.MemorySpace.VMEM)

    out_padded = pl.pallas_call(
        rnn_classifier_kernel,
        out_shape=jax.ShapeDtypeStruct((bpad, cpad), jnp.float32),
        in_specs=[vmem] * 6,
        out_specs=vmem,
    )(x2d, wih_t, bsum, whh_t, wfc_t, bfc_p)

    return out_padded[:batch, :classes]


def init_params(key, input_size, hidden_size, classes):
    """Deterministic PyTorch-Linear-style init (uniform +/- 1/sqrt(fan_in))."""
    k = jax.random.split(key, 6)
    b_ih_bound = 1.0 / jnp.sqrt(input_size)
    b_hh_bound = 1.0 / jnp.sqrt(hidden_size)
    b_fc_bound = 1.0 / jnp.sqrt(hidden_size)
    w_ih = jax.random.uniform(k[0], (hidden_size, input_size), jnp.float32,
                              -b_ih_bound, b_ih_bound)
    b_ih = jax.random.uniform(k[1], (hidden_size,), jnp.float32,
                              -b_ih_bound, b_ih_bound)
    w_hh = jax.random.uniform(k[2], (hidden_size, hidden_size), jnp.float32,
                              -b_hh_bound, b_hh_bound)
    b_hh = jax.random.uniform(k[3], (hidden_size,), jnp.float32,
                              -b_hh_bound, b_hh_bound)
    w_fc = jax.random.uniform(k[4], (classes, hidden_size), jnp.float32,
                              -b_fc_bound, b_fc_bound)
    b_fc = jax.random.uniform(k[5], (classes,), jnp.float32,
                              -b_fc_bound, b_fc_bound)
    return (w_ih, b_ih, w_hh, b_hh, w_fc, b_fc)


def reference_forward(x, params):
    """Pure-JAX f32 reference matching the PyTorch forward exactly."""
    w_ih, b_ih, w_hh, b_hh, w_fc, b_fc = params
    seq_len, batch, _ = x.shape
    hidden = w_hh.shape[0]
    h = jnp.zeros((batch, hidden), jnp.float32)
    for t in range(seq_len):
        h = jnp.tanh(h @ w_hh.T + b_hh + x[t] @ w_ih.T + b_ih)
    return h @ w_fc.T + b_fc


if __name__ == "__main__":
    seq_len, batch, input_size = 8, 2, 28
    hidden_size, classes = 128, 10

    key = jax.random.PRNGKey(0)
    kx, kp = jax.random.split(key)
    x = jax.random.normal(kx, (seq_len, batch, input_size), jnp.float32)
    params = init_params(kp, input_size, hidden_size, classes)

    fwd = jax.jit(rnn_classifier_forward)
    out = jax.block_until_ready(fwd(x, params))

    ref = reference_forward(x, params)
    assert out.shape == (batch, classes)
    # bf16 matmul operands with f32 accumulation -> compare against the f32
    # reference with a slightly looser tolerance (per review guidance).
    assert jnp.allclose(out, ref, atol=2e-2, rtol=2e-2), "mismatch vs reference"

    print("KERNEL_OK")
</pallas_src>

<mosaic_0001>
module attributes {stable_mosaic.version = 11 : i64} {
  func.func @rnn_classifier_kernel(%arg0: memref<64x28xbf16, #tpu.memory_space<vmem>>, %arg1: memref<28x128xbf16, #tpu.memory_space<vmem>>, %arg2: memref<1x128xf32, #tpu.memory_space<vmem>>, %arg3: memref<128x128xbf16, #tpu.memory_space<vmem>>, %arg4: memref<128x128xf32, #tpu.memory_space<vmem>>, %arg5: memref<1x128xf32, #tpu.memory_space<vmem>>, %arg6: memref<8x128xf32, #tpu.memory_space<vmem>>) attributes {dimension_semantics = [], scalar_prefetch = 0 : i64, scratch_operands = 0 : i64, tpu.core_type = #tpu.core_type<tc>} {
    %c0 = arith.constant 0 : index
    %c0_0 = arith.constant 0 : index
    %0 = vector.load %arg0[%c0, %c0_0] : memref<64x28xbf16, #tpu.memory_space<vmem>>, vector<64x28xbf16>
    %c0_1 = arith.constant 0 : index
    %c0_2 = arith.constant 0 : index
    %1 = vector.load %arg1[%c0_1, %c0_2] : memref<28x128xbf16, #tpu.memory_space<vmem>>, vector<28x128xbf16>
    %cst = arith.constant dense<0.000000e+00> : vector<64x128xf32>
    %2 = tpu.matmul %0, %1, %cst {dimension_numbers = #tpu.dot_dimension_numbers<[1], [0], [0], [1], [0, 0, 1, 1], [], []>} : vector<64x28xbf16>, vector<28x128xbf16>, vector<64x128xf32> -> vector<64x128xf32>
    %c0_3 = arith.constant 0 : index
    %c0_4 = arith.constant 0 : index
    %3 = vector.load %arg2[%c0_3, %c0_4] : memref<1x128xf32, #tpu.memory_space<vmem>>, vector<1x128xf32>
    %4 = vector.broadcast %3 : vector<1x128xf32> to vector<64x128xf32>
    %5 = arith.addf %2, %4 : vector<64x128xf32>
    %c0_5 = arith.constant 0 : index
    %c0_6 = arith.constant 0 : index
    %6 = vector.load %arg3[%c0_5, %c0_6] : memref<128x128xbf16, #tpu.memory_space<vmem>>, vector<128x128xbf16>
    %7 = vector.extract_strided_slice %5 {offsets = [0, 0], sizes = [8, 128], strides = [1, 1]} : vector<64x128xf32> to vector<8x128xf32>
    %8 = math.tanh %7 : vector<8x128xf32>
    %9 = arith.truncf %8 : vector<8x128xf32> to vector<8x128xbf16>
    %cst_7 = arith.constant dense<0.000000e+00> : vector<8x128xf32>
    %10 = tpu.matmul %9, %6, %cst_7 {dimension_numbers = #tpu.dot_dimension_numbers<[1], [0], [0], [1], [0, 0, 1, 1], [], []>} : vector<8x128xbf16>, vector<128x128xbf16>, vector<8x128xf32> -> vector<8x128xf32>
    %11 = vector.extract_strided_slice %5 {offsets = [8, 0], sizes = [8, 128], strides = [1, 1]} : vector<64x128xf32> to vector<8x128xf32>
    %12 = arith.addf %10, %11 : vector<8x128xf32>
    %13 = math.tanh %12 : vector<8x128xf32>
    %14 = arith.truncf %13 : vector<8x128xf32> to vector<8x128xbf16>
    %cst_8 = arith.constant dense<0.000000e+00> : vector<8x128xf32>
    %15 = tpu.matmul %14, %6, %cst_8 {dimension_numbers = #tpu.dot_dimension_numbers<[1], [0], [0], [1], [0, 0, 1, 1], [], []>} : vector<8x128xbf16>, vector<128x128xbf16>, vector<8x128xf32> -> vector<8x128xf32>
    %16 = vector.extract_strided_slice %5 {offsets = [16, 0], sizes = [8, 128], strides = [1, 1]} : vector<64x128xf32> to vector<8x128xf32>
    %17 = arith.addf %15, %16 : vector<8x128xf32>
    %18 = math.tanh %17 : vector<8x128xf32>
    %19 = arith.truncf %18 : vector<8x128xf32> to vector<8x128xbf16>
    %cst_9 = arith.constant dense<0.000000e+00> : vector<8x128xf32>
    %20 = tpu.matmul %19, %6, %cst_9 {dimension_numbers = #tpu.dot_dimension_numbers<[1], [0], [0], [1], [0, 0, 1, 1], [], []>} : vector<8x128xbf16>, vector<128x128xbf16>, vector<8x128xf32> -> vector<8x128xf32>
    %21 = vector.extract_strided_slice %5 {offsets = [24, 0], sizes = [8, 128], strides = [1, 1]} : vector<64x128xf32> to vector<8x128xf32>
    %22 = arith.addf %20, %21 : vector<8x128xf32>
    %23 = math.tanh %22 : vector<8x128xf32>
    %24 = arith.truncf %23 : vector<8x128xf32> to vector<8x128xbf16>
    %cst_10 = arith.constant dense<0.000000e+00> : vector<8x128xf32>
    %25 = tpu.matmul %24, %6, %cst_10 {dimension_numbers = #tpu.dot_dimension_numbers<[1], [0], [0], [1], [0, 0, 1, 1], [], []>} : vector<8x128xbf16>, vector<128x128xbf16>, vector<8x128xf32> -> vector<8x128xf32>
    %26 = vector.extract_strided_slice %5 {offsets = [32, 0], sizes = [8, 128], strides = [1, 1]} : vector<64x128xf32> to vector<8x128xf32>
    %27 = arith.addf %25, %26 : vector<8x128xf32>
    %28 = math.tanh %27 : vector<8x128xf32>
    %29 = arith.truncf %28 : vector<8x128xf32> to vector<8x128xbf16>
    %cst_11 = arith.constant dense<0.000000e+00> : vector<8x128xf32>
    %30 = tpu.matmul %29, %6, %cst_11 {dimension_numbers = #tpu.dot_dimension_numbers<[1], [0], [0], [1], [0, 0, 1, 1], [], []>} : vector<8x128xbf16>, vector<128x128xbf16>, vector<8x128xf32> -> vector<8x128xf32>
    %31 = vector.extract_strided_slice %5 {offsets = [40, 0], sizes = [8, 128], strides = [1, 1]} : vector<64x128xf32> to vector<8x128xf32>
    %32 = arith.addf %30, %31 : vector<8x128xf32>
    %33 = math.tanh %32 : vector<8x128xf32>
    %34 = arith.truncf %33 : vector<8x128xf32> to vector<8x128xbf16>
    %cst_12 = arith.constant dense<0.000000e+00> : vector<8x128xf32>
    %35 = tpu.matmul %34, %6, %cst_12 {dimension_numbers = #tpu.dot_dimension_numbers<[1], [0], [0], [1], [0, 0, 1, 1], [], []>} : vector<8x128xbf16>, vector<128x128xbf16>, vector<8x128xf32> -> vector<8x128xf32>
    %36 = vector.extract_strided_slice %5 {offsets = [48, 0], sizes = [8, 128], strides = [1, 1]} : vector<64x128xf32> to vector<8x128xf32>
    %37 = arith.addf %35, %36 : vector<8x128xf32>
    %38 = math.tanh %37 : vector<8x128xf32>
    %39 = arith.truncf %38 : vector<8x128xf32> to vector<8x128xbf16>
    %cst_13 = arith.constant dense<0.000000e+00> : vector<8x128xf32>
    %40 = tpu.matmul %39, %6, %cst_13 {dimension_numbers = #tpu.dot_dimension_numbers<[1], [0], [0], [1], [0, 0, 1, 1], [], []>} : vector<8x128xbf16>, vector<128x128xbf16>, vector<8x128xf32> -> vector<8x128xf32>
    %41 = vector.extract_strided_slice %5 {offsets = [56, 0], sizes = [8, 128], strides = [1, 1]} : vector<64x128xf32> to vector<8x128xf32>
    %42 = arith.addf %40, %41 : vector<8x128xf32>
    %43 = math.tanh %42 : vector<8x128xf32>
    %c0_14 = arith.constant 0 : index
    %c0_15 = arith.constant 0 : index
    %44 = vector.load %arg4[%c0_14, %c0_15] : memref<128x128xf32, #tpu.memory_space<vmem>>, vector<128x128xf32>
    %cst_16 = arith.constant dense<0.000000e+00> : vector<8x128xf32>
    %45 = tpu.matmul %43, %44, %cst_16 {dimension_numbers = #tpu.dot_dimension_numbers<[1], [0], [0], [1], [0, 0, 1, 1], [], []>} : vector<8x128xf32>, vector<128x128xf32>, vector<8x128xf32> -> vector<8x128xf32>
    %c0_17 = arith.constant 0 : index
    %c0_18 = arith.constant 0 : index
    %46 = vector.load %arg5[%c0_17, %c0_18] : memref<1x128xf32, #tpu.memory_space<vmem>>, vector<1x128xf32>
    %47 = vector.broadcast %46 : vector<1x128xf32> to vector<8x128xf32>
    %48 = arith.addf %45, %47 : vector<8x128xf32>
    %c0_19 = arith.constant 0 : index
    %c0_20 = arith.constant 0 : index
    %49 = vector.load %arg6[%c0_19, %c0_20] : memref<8x128xf32, #tpu.memory_space<vmem>>, vector<8x128xf32>
    tpu.vector_store %arg6[%c0_19, %c0_20], %48 {strides = array<i32>} : memref<8x128xf32, #tpu.memory_space<vmem>>, vector<8x128xf32>,
    return
  }
}

</mosaic_0001>

<bundles_post_ra>
// kernel: rnn_classifier_forward.1
= control target key start
LH: loop header
LB: loop body
LE: loop exit
PB: predicated region body
PF: predicated region fallthrough
CT: control target
= control target key end

     0   :  { %vm87_vm0 = vcmask 1045504   ;;  %vm74_vm1 = vcmask 228352   ;;  %v964_v1 = vmov 0.0   ;;  %vm965_vm2 = vmmov 0   ;;  %s1271_s1 = inlined_call_operand.vmem [shape: bf16[28,128], index: 1, kind: input, shape index: {}]   ;;  %s1272_s0 = inlined_call_operand.vmem [shape: bf16[64,28], index: 0, kind: input, shape index: {}]   ;;  %s1273_s3 = inlined_call_operand.vmem [shape: bf16[128,128], index: 3, kind: input, shape index: {}]   ;;  %s1274_s2 = inlined_call_operand.vmem [shape: f32[1,128], index: 2, kind: input, shape index: {}]   ;;  %s1275_s4 = inlined_call_operand.vmem [shape: f32[128,128], index: 4, kind: input, shape index: {}]   ;;  %s1276_s5 = inlined_call_operand.vmem [shape: f32[1,128], index: 5, kind: input, shape index: {}]   ;;  %s1277_s6 = inlined_call_operand.vmem [shape: f32[8,128], index: 6, kind: output, shape index: {}]  }
   0x1   :  { %v934_v0 = vld [vmem:[%s1271_s1] sm:$0xff]   ;;  %731 = vmatprep.subr.bf16.mxu1 %v964_v1  ;;  %v935_v2 = vld [vmem:[%s1271_s1 + $0x8] sm:$0x3f]   ;;  %v1031_v8 = vld [vmem:[%s1273_s3 + $0x10] sm:$0xff]   ;;  %747 = vmatprep.mubr.msk.bf16.mxu1 %vm965_vm2, %v964_v1 }
   0x2   :  { %719 = vmatprep.subr.bf16.mxu0 %v934_v0  ;;  %v936_v3 = vld [vmem:[%s1272_s0] sm:$0xff]   ;;  %v89_v4 = vsel %vm87_vm0, %v935_v2, 0  ;;  %v937_v6 = vld [vmem:[%s1272_s0 + $0x8] sm:$0xff]   ;;  %v1043_v9 = vld [vmem:[%s1273_s3 + $0x18] sm:$0xff]  }
   0x3   :  { %720 = vmatpush3.bf16.msra.mxu0 %v934_v0  ;;  %723 = vmatprep.mubr.msk.bf16.mxu0 %vm74_vm1, %v936_v3  ;;  %v1016_v5 = vld [vmem:[%s1273_s3] sm:$0xff]   ;;  %v1025_v7 = vld [vmem:[%s1273_s3 + $0x8] sm:$0xff]   ;;  %v1075_v12 = vld [vmem:[%s1273_s3 + $0x30] sm:$0xff]  }
   0x4   :  { %930 = vmatprep.subr.msk.bf16.mxu0 %vm87_vm0, %v935_v2  ;;  %732 = vmatpush3.bf16.msra.mxu1 %v1016_v5  ;;  %v1057_v10 = vld [vmem:[%s1273_s3 + $0x20] sm:$0xff]   ;;  %v1066_v11 = vld [vmem:[%s1273_s3 + $0x28] sm:$0xff]   ;;  %v1084_v13 = vld [vmem:[%s1273_s3 + $0x38] sm:$0xff]  }
   0x5   :  { %733 = vmatprep.subr.bf16.mxu1 %v964_v1  ;;  %v1095_v14 = vld [vmem:[%s1274_s2] ss:$0 sm:$0xff]  ;;  %v946_v22 = vld [vmem:[%s1272_s0 + $0x10] sm:$0xff]   ;;  %v947_v23 = vld [vmem:[%s1272_s0 + $0x18] sm:$0xff]  }
   0x7   :  { %722 = vmatpush3.bf16.msra.mxu0 %v89_v4 }
   0x8   :  { %751 = vmatprep.subr.bf16.mxu0 %v964_v1  ;;  %734 = vmatpush3.bf16.msra.mxu1 %v1025_v7 }
   0x9   :  { %735 = vmatprep.subr.bf16.mxu1 %v964_v1 }
   0xa   :  { %724 = vmatmul.mubr.msk.bf16.vlgmr.msra.gmra.mrb[0].mxu0 %vm74_vm1, %v937_v6  ;;  %v515_v6 = vld [vmem:[%s1275_s4] sm:$0xff] }
   0xb   :  { %752 = vmatpush3.bf16.msra.mxu0 %v1016_v5  ;;  %727 = vmatprep.mubr.msk.bf16.mxu0 %vm74_vm1, %v946_v22 }
   0xc   :  { %753 = vmatprep.subr.bf16.mxu0 %v964_v1  ;;  %736 = vmatpush3.bf16.msra.mxu1 %v1031_v8 }
   0xd   :  { %737 = vmatprep.subr.bf16.mxu1 %v964_v1 }
   0xf   :  { %754 = vmatpush3.bf16.msra.mxu0 %v1025_v7 }
  0x10   :  { %755 = vmatprep.subr.bf16.mxu0 %v964_v1  ;;  %738 = vmatpush3.bf16.msra.mxu1 %v1043_v9 }
  0x11   :  { %739 = vmatprep.subr.bf16.mxu1 %v964_v1 }
  0x12   :  { %728 = vmatmul.mubr.msk.bf16.gmra.mrb[4].mxu0 %vm74_vm1, %v947_v23 }
  0x13   :  { %756 = vmatpush3.bf16.msra.mxu0 %v1031_v8  ;;  %767 = vmatprep.mubr.msk.bf16.mxu0 %vm965_vm2, %v964_v1 }
  0x14   :  { %757 = vmatprep.subr.bf16.mxu0 %v964_v1  ;;  %740 = vmatpush3.bf16.msra.mxu1 %v1057_v10 }
  0x15   :  { %741 = vmatprep.subr.bf16.mxu1 %v964_v1 }
  0x17   :  { %758 = vmatpush3.bf16.msra.mxu0 %v1043_v9 }
  0x18   :  { %759 = vmatprep.subr.bf16.mxu0 %v964_v1  ;;  %742 = vmatpush3.bf16.msra.mxu1 %v1066_v11 }
  0x19   :  { %743 = vmatprep.subr.bf16.mxu1 %v964_v1 }
  0x1b   :  { %760 = vmatpush3.bf16.msra.mxu0 %v1057_v10 }
  0x1c   :  { %761 = vmatprep.subr.bf16.mxu0 %v964_v1  ;;  %744 = vmatpush3.bf16.msra.mxu1 %v1075_v12 }
  0x1d   :  { %745 = vmatprep.subr.bf16.mxu1 %v964_v1 }
  0x1f   :  { %762 = vmatpush3.bf16.msra.mxu0 %v1066_v11 }
  0x20   :  { %763 = vmatprep.subr.bf16.mxu0 %v964_v1  ;;  %746 = vmatpush3.bf16.msra.mxu1 %v1084_v13 }
  0x21   :  { %771 = vmatprep.subr.bf16.mxu1 %v964_v1 }
  0x23   :  { %764 = vmatpush3.bf16.msra.mxu0 %v1075_v12 }
  0x24   :  { %765 = vmatprep.subr.bf16.mxu0 %v964_v1 }
  0x27   :  { %766 = vmatpush3.bf16.msra.mxu0 %v1084_v13 }
  0x28   :  { %791 = vmatprep.subr.bf16.mxu0 %v964_v1 }
  0xdd   :  { %v725_v15 = vpop.f32.mrb[0].mxu0 }
  0xde   :  { %v125_v16 = vpop.f32.mrb[1].mxu0  ;;  %v134_v36 = vadd.f32 %v725_v15, %v1095_v14  ;;  %v521_v15 = vld [vmem:[%s1275_s4 + $0x30] sm:$0xff] }
  0xdf   :  { %v126_v17 = vadd.f32 %v1095_v14, %v125_v16  ;;  %v1098_v18 = vpop.f32.mrb[2].mxu0  ;;  %v522_v16 = vld [vmem:[%s1275_s4 + $0x38] sm:$0xff] }
  0xe0   :  { %v128_v19 = vpop.f32.mrb[3].mxu0  ;;  %v137_v44 = vadd.f32 %v1098_v18, %v1095_v14  ;;  %v523_v18 = vld [vmem:[%s1275_s4 + $0x40] sm:$0xff] }
  0xe1   :  { %948 = vtanh.f32 %v126_v17  ;;  %v129_v24 = vadd.f32 %v1095_v14, %v128_v19  ;;  %v916_v17 = vpack.c.bf16 %v522_v16, %v521_v15  ;;  %v524_v19 = vld [vmem:[%s1275_s4 + $0x48] sm:$0xff] }
  0xe5   :  { %v1147_v32 = vpop.f32.mrb[4].mxu0 }
  0xe6   :  { %v141_v33 = vpop.f32.mrb[5].mxu0 }
  0xe7   :  { %v1149_v34 = vpop.f32.mrb[6].mxu0  ;;  %v142_v52 = vadd.f32 %v1095_v14, %v141_v33  ;;  %v528_v33 = vld [vmem:[%s1275_s4 + $0x68] sm:$0xff] }
  0xe8   :  { %v1151_v35 = vpop.f32.mrb[7].mxu0 }
  0xe9   :  { %v145_v60 = vadd.f32 %v1095_v14, %v1151_v35 }
  0xeb   :  { %v949_v20 = vpop.eup %948 }
  0xec   :  { %v173_v21 = vpack.c.bf16 %v949_v20, %v949_v20  ;;  %v919_v20 = vpack.c.bf16 %v524_v19, %v523_v18 }
  0xee   :  { %748 = vmatmul.mubr.bf16.vlgmr.msra.gmra.mrb[0].mxu1 %v173_v21  ;;  %v150_v21 = vadd.f32 %v1147_v32, %v1095_v14  ;;  %v527_v32 = vld [vmem:[%s1275_s4 + $0x60] sm:$0xff] }
  0xef   :  { %772 = vmatpush3.bf16.msra.mxu1 %v1016_v5  ;;  %787 = vmatprep.mubr.msk.bf16.mxu1 %vm965_vm2, %v964_v1  ;;  %v925_v35 = vpack.c.bf16 %v528_v33, %v527_v32 }
  0xf0   :  { %773 = vmatprep.subr.bf16.mxu1 %v964_v1 }
  0xf3   :  { %774 = vmatpush3.bf16.msra.mxu1 %v1025_v7 }
  0xf4   :  { %775 = vmatprep.subr.bf16.mxu1 %v964_v1 }
  0xf7   :  { %776 = vmatpush3.bf16.msra.mxu1 %v1031_v8 }
  0xf8   :  { %777 = vmatprep.subr.bf16.mxu1 %v964_v1 }
  0xfb   :  { %778 = vmatpush3.bf16.msra.mxu1 %v1043_v9 }
  0xfc   :  { %779 = vmatprep.subr.bf16.mxu1 %v964_v1 }
  0xff   :  { %780 = vmatpush3.bf16.msra.mxu1 %v1057_v10 }
 0x100   :  { %781 = vmatprep.subr.bf16.mxu1 %v964_v1 }
 0x103   :  { %782 = vmatpush3.bf16.msra.mxu1 %v1066_v11 }
 0x104   :  { %783 = vmatprep.subr.bf16.mxu1 %v964_v1 }
 0x107   :  { %784 = vmatpush3.bf16.msra.mxu1 %v1075_v12 }
 0x108   :  { %785 = vmatprep.subr.bf16.mxu1 %v964_v1 }
 0x10b   :  { %786 = vmatpush3.bf16.msra.mxu1 %v1084_v13 }
 0x10c   :  { %811 = vmatprep.subr.bf16.mxu1 %v964_v1 }
 0x1c1   :  { %v256_v25 = vpop.f32.mrb[0].mxu1 }
 0x1c2   :  { %v257_v26 = vadd.f32 %v256_v25, %v129_v24  ;;  %v749_v27 = vpop.f32.mrb[1].mxu1 }
 0x1c3   :  { %v259_v28 = vpop.f32.mrb[2].mxu1 }
 0x1c4   :  { %950 = vtanh.f32 %v257_v26  ;;  %v750_v29 = vpop.f32.mrb[3].mxu1 }
 0x1c5   :  { %v525_v29 = vld [vmem:[%s1275_s4 + $0x50] sm:$0xff] }
 0x1ce   :  { %v951_v30 = vpop.eup %950 }
 0x1cf   :  { %v263_v31 = vpack.c.bf16 %v951_v30, %v951_v30  ;;  %v526_v30 = vld [vmem:[%s1275_s4 + $0x58] sm:$0xff] }
 0x1d1   :  { %768 = vmatmul.mubr.bf16.vlgmr.msra.gmra.mrb[8].mxu0 %v263_v31  ;;  %v922_v31 = vpack.c.bf16 %v526_v30, %v525_v29 }
 0x1d2   :  { %792 = vmatpush3.bf16.msra.mxu0 %v1016_v5  ;;  %807 = vmatprep.mubr.msk.bf16.mxu0 %vm965_vm2, %v964_v1 }
 0x1d3   :  { %793 = vmatprep.subr.bf16.mxu0 %v964_v1 }
 0x1d6   :  { %794 = vmatpush3.bf16.msra.mxu0 %v1025_v7 }
 0x1d7   :  { %795 = vmatprep.subr.bf16.mxu0 %v964_v1 }
 0x1da   :  { %796 = vmatpush3.bf16.msra.mxu0 %v1031_v8 }
 0x1db   :  { %797 = vmatprep.subr.bf16.mxu0 %v964_v1 }
 0x1de   :  { %798 = vmatpush3.bf16.msra.mxu0 %v1043_v9 }
 0x1df   :  { %799 = vmatprep.subr.bf16.mxu0 %v964_v1 }
 0x1e2   :  { %800 = vmatpush3.bf16.msra.mxu0 %v1057_v10 }
 0x1e3   :  { %801 = vmatprep.subr.bf16.mxu0 %v964_v1 }
 0x1e6   :  { %802 = vmatpush3.bf16.msra.mxu0 %v1066_v11 }
 0x1e7   :  { %803 = vmatprep.subr.bf16.mxu0 %v964_v1 }
 0x1ea   :  { %804 = vmatpush3.bf16.msra.mxu0 %v1075_v12 }
 0x1eb   :  { %805 = vmatprep.subr.bf16.mxu0 %v964_v1 }
 0x1ee   :  { %806 = vmatpush3.bf16.msra.mxu0 %v1084_v13 }
 0x1ef   :  { %831 = vmatprep.subr.bf16.mxu0 %v964_v1 }
 0x2a4   :  { %v298_v37 = vpop.f32.mrb[8].mxu0 }
 0x2a5   :  { %v299_v38 = vadd.f32 %v298_v37, %v134_v36  ;;  %v769_v39 = vpop.f32.mrb[9].mxu0  ;;  %v529_v36 = vld [vmem:[%s1275_s4 + $0x70] sm:$0xff]  ;;  %v530_v37 = vld [vmem:[%s1275_s4 + $0x78] sm:$0xff] }
 0x2a6   :  { %v301_v40 = vpop.f32.mrb[10].mxu0  ;;  %v153_v39 = vadd.f32 %v1149_v34, %v1095_v14 }
 0x2a7   :  { %952 = vtanh.f32 %v299_v38  ;;  %v770_v41 = vpop.f32.mrb[11].mxu0  ;;  %v928_v38 = vpack.c.bf16 %v530_v37, %v529_v36 }
 0x2b1   :  { %v953_v42 = vpop.eup %952 }
 0x2b2   :  { %v305_v43 = vpack.c.bf16 %v953_v42, %v953_v42 }
 0x2b4   :  { %788 = vmatmul.mubr.bf16.vlgmr.msra.gmra.mrb[4].mxu1 %v305_v43 }
 0x2b5   :  { %812 = vmatpush3.bf16.msra.mxu1 %v1016_v5  ;;  %827 = vmatprep.mubr.msk.bf16.mxu1 %vm965_vm2, %v964_v1 }
 0x2b6   :  { %813 = vmatprep.subr.bf16.mxu1 %v964_v1 }
 0x2b9   :  { %814 = vmatpush3.bf16.msra.mxu1 %v1025_v7 }
 0x2ba   :  { %815 = vmatprep.subr.bf16.mxu1 %v964_v1 }
 0x2bd   :  { %816 = vmatpush3.bf16.msra.mxu1 %v1031_v8 }
 0x2be   :  { %817 = vmatprep.subr.bf16.mxu1 %v964_v1 }
 0x2c1   :  { %818 = vmatpush3.bf16.msra.mxu1 %v1043_v9 }
 0x2c2   :  { %819 = vmatprep.subr.bf16.mxu1 %v964_v1 }
 0x2c5   :  { %820 = vmatpush3.bf16.msra.mxu1 %v1057_v10 }
 0x2c6   :  { %821 = vmatprep.subr.bf16.mxu1 %v964_v1 }
 0x2c9   :  { %822 = vmatpush3.bf16.msra.mxu1 %v1066_v11 }
 0x2ca   :  { %823 = vmatprep.subr.bf16.mxu1 %v964_v1 }
 0x2cd   :  { %824 = vmatpush3.bf16.msra.mxu1 %v1075_v12 }
 0x2ce   :  { %825 = vmatprep.subr.bf16.mxu1 %v964_v1 }
 0x2d1   :  { %826 = vmatpush3.bf16.msra.mxu1 %v1084_v13 }
 0x2d2   :  { %851 = vmatprep.subr.bf16.mxu1 %v964_v1 }
 0x387   :  { %v340_v45 = vpop.f32.mrb[4].mxu1 }
 0x388   :  { %v341_v46 = vadd.f32 %v340_v45, %v137_v44  ;;  %v789_v47 = vpop.f32.mrb[5].mxu1 }
 0x389   :  { %v343_v48 = vpop.f32.mrb[6].mxu1 }
 0x38a   :  { %954 = vtanh.f32 %v341_v46  ;;  %v790_v49 = vpop.f32.mrb[7].mxu1  ;;  %v632_v46 = vld [vmem:[%s1276_s5] ss:$0 sm:$0xff] }
 0x394   :  { %v955_v50 = vpop.eup %954 }
 0x395   :  { %v347_v51 = vpack.c.bf16 %v955_v50, %v955_v50 }
 0x397   :  { %808 = vmatmul.mubr.bf16.vlgmr.msra.gmra.mrb[12].mxu0 %v347_v51 }
 0x398   :  { %832 = vmatpush3.bf16.msra.mxu0 %v1016_v5  ;;  %847 = vmatprep.mubr.msk.bf16.mxu0 %vm965_vm2, %v964_v1 }
 0x399   :  { %833 = vmatprep.subr.bf16.mxu0 %v964_v1 }
 0x39c   :  { %834 = vmatpush3.bf16.msra.mxu0 %v1025_v7 }
 0x39d   :  { %835 = vmatprep.subr.bf16.mxu0 %v964_v1 }
 0x3a0   :  { %836 = vmatpush3.bf16.msra.mxu0 %v1031_v8 }
 0x3a1   :  { %837 = vmatprep.subr.bf16.mxu0 %v964_v1 }
 0x3a4   :  { %838 = vmatpush3.bf16.msra.mxu0 %v1043_v9 }
 0x3a5   :  { %839 = vmatprep.subr.bf16.mxu0 %v964_v1 }
 0x3a8   :  { %840 = vmatpush3.bf16.msra.mxu0 %v1057_v10 }
 0x3a9   :  { %841 = vmatprep.subr.bf16.mxu0 %v964_v1 }
 0x3ac   :  { %842 = vmatpush3.bf16.msra.mxu0 %v1066_v11 }
 0x3ad   :  { %843 = vmatprep.subr.bf16.mxu0 %v964_v1 }
 0x3b0   :  { %844 = vmatpush3.bf16.msra.mxu0 %v1075_v12 }
 0x3b1   :  { %845 = vmatprep.subr.bf16.mxu0 %v964_v1 }
 0x3b4   :  { %846 = vmatpush3.bf16.msra.mxu0 %v1084_v13 }
 0x46a   :  { %v382_v53 = vpop.f32.mrb[12].mxu0 }
 0x46b   :  { %v383_v54 = vadd.f32 %v382_v53, %v142_v52  ;;  %v809_v55 = vpop.f32.mrb[13].mxu0 }
 0x46c   :  { %v385_v56 = vpop.f32.mrb[14].mxu0 }
 0x46d   :  { %956 = vtanh.f32 %v383_v54  ;;  %v810_v57 = vpop.f32.mrb[15].mxu0 }
 0x477   :  { %v957_v58 = vpop.eup %956 }
 0x478   :  { %v389_v59 = vpack.c.bf16 %v957_v58, %v957_v58 }
 0x47a   :  { %828 = vmatmul.mubr.bf16.vlgmr.msra.gmra.mrb[8].mxu1 %v389_v59 }
 0x47b   :  { %852 = vmatpush3.bf16.msra.mxu1 %v1016_v5  ;;  %867 = vmatprep.mubr.msk.bf16.mxu1 %vm965_vm2, %v964_v1  ;;  %v966_v5 = vmov 0.0|0.0  }
 0x47c   :  { %853 = vmatprep.subr.bf16.mxu1 %v964_v1  ;;  %906 = vmatprep.subr.bf16.mxu0 %v966_v5 }
 0x47f   :  { %854 = vmatpush3.bf16.msra.mxu1 %v1025_v7  ;;  %v516_v7 = vld [vmem:[%s1275_s4 + $0x8] sm:$0xff] }
 0x480   :  { %855 = vmatprep.subr.bf16.mxu1 %v964_v1 }
 0x483   :  { %856 = vmatpush3.bf16.msra.mxu1 %v1031_v8  ;;  %v517_v8 = vld [vmem:[%s1275_s4 + $0x10] sm:$0xff] }
 0x484   :  { %857 = vmatprep.subr.bf16.mxu1 %v964_v1 }
 0x487   :  { %858 = vmatpush3.bf16.msra.mxu1 %v1043_v9  ;;  %v907_v9 = vpack.c.bf16 %v516_v7, %v515_v6 }
 0x488   :  { %859 = vmatprep.subr.bf16.mxu1 %v964_v1 }
 0x48b   :  { %860 = vmatpush3.bf16.msra.mxu1 %v1057_v10  ;;  %v518_v10 = vld [vmem:[%s1275_s4 + $0x18] sm:$0xff] }
 0x48c   :  { %861 = vmatprep.subr.bf16.mxu1 %v964_v1 }
 0x48f   :  { %862 = vmatpush3.bf16.msra.mxu1 %v1066_v11  ;;  %v519_v11 = vld [vmem:[%s1275_s4 + $0x20] sm:$0xff] }
 0x490   :  { %863 = vmatprep.subr.bf16.mxu1 %v964_v1 }
 0x493   :  { %864 = vmatpush3.bf16.msra.mxu1 %v1075_v12  ;;  %v520_v12 = vld [vmem:[%s1275_s4 + $0x28] sm:$0xff] }
 0x494   :  { %865 = vmatprep.subr.bf16.mxu1 %v964_v1 }
 0x497   :  { %866 = vmatpush3.bf16.msra.mxu1 %v1084_v13  ;;  %v913_v13 = vpack.c.bf16 %v520_v12, %v519_v11 }
 0x54d   :  { %v424_v61 = vpop.f32.mrb[8].mxu1 }
 0x54e   :  { %v425_v62 = vadd.f32 %v424_v61, %v145_v60  ;;  %v829_v63 = vpop.f32.mrb[9].mxu1 }
 0x54f   :  { %v427_v0 = vpop.f32.mrb[10].mxu1 }
 0x550   :  { %958 = vtanh.f32 %v425_v62  ;;  %v830_v2 = vpop.f32.mrb[11].mxu1 }
 0x55a   :  { %v959_v3 = vpop.eup %958 }
 0x55b   :  { %v431_v4 = vpack.c.bf16 %v959_v3, %v959_v3 }
 0x55d   :  { %848 = vmatmul.mubr.bf16.vlgmr.msra.gmra.mrb[16].mxu0 %v431_v4 }
 0x55e   :  { %903 = vmatprep.mubr.msk.f32.mxu0 %vm965_vm2, %v964_v1  ;;  %908 = vmatpush3.bf16.msra.mxu0 %v907_v9  ;;  %v910_v1 = vpack.c.bf16 %v518_v10, %v517_v8 }
 0x55f   :  { %909 = vmatprep.subr.bf16.mxu0 %v966_v5 }
 0x562   :  { %911 = vmatpush3.bf16.msra.mxu0 %v910_v1 }
 0x563   :  { %912 = vmatprep.subr.bf16.mxu0 %v966_v5 }
 0x566   :  { %914 = vmatpush3.bf16.msra.mxu0 %v913_v13 }
 0x567   :  { %915 = vmatprep.subr.bf16.mxu0 %v966_v5 }
 0x56a   :  { %917 = vmatpush3.bf16.msra.mxu0 %v916_v17 }
 0x56b   :  { %918 = vmatprep.subr.bf16.mxu0 %v966_v5 }
 0x56e   :  { %920 = vmatpush3.bf16.msra.mxu0 %v919_v20 }
 0x56f   :  { %921 = vmatprep.subr.bf16.mxu0 %v966_v5 }
 0x572   :  { %923 = vmatpush3.bf16.msra.mxu0 %v922_v31 }
 0x573   :  { %924 = vmatprep.subr.bf16.mxu0 %v966_v5 }
 0x576   :  { %926 = vmatpush3.bf16.msra.mxu0 %v925_v35 }
 0x577   :  { %927 = vmatprep.subr.bf16.mxu0 %v966_v5 }
 0x57a   :  { %929 = vmatpush3.bf16.msra.mxu0 %v928_v38 }
 0x630   :  { %v466_v22 = vpop.f32.mrb[16].mxu0 }
 0x631   :  { %v467_v23 = vadd.f32 %v466_v22, %v150_v21  ;;  %v849_v24 = vpop.f32.mrb[17].mxu0 }
 0x632   :  { %v469_v25 = vpop.f32.mrb[18].mxu0 }
 0x633   :  { %960 = vtanh.f32 %v467_v23  ;;  %v850_v26 = vpop.f32.mrb[19].mxu0 }
 0x63d   :  { %v961_v27 = vpop.eup %960 }
 0x63e   :  { %v473_v28 = vpack.c.bf16 %v961_v27, %v961_v27 }
 0x640   :  { %868 = vmatmul.mubr.bf16.vlgmr.msra.gmra.mrb[12].mxu1 %v473_v28 }
 0x713   :  { %v508_v40 = vpop.f32.mrb[12].mxu1 }
 0x714   :  { %v509_v41 = vadd.f32 %v508_v40, %v153_v39  ;;  %v869_v42 = vpop.f32.mrb[13].mxu1 }
 0x715   :  { %v511_v43 = vpop.f32.mrb[14].mxu1 }
 0x716   :  { %962 = vtanh.f32 %v509_v41  ;;  %v870_v44 = vpop.f32.mrb[15].mxu1 }
 0x720   :  { %v963_v45 = vpop.eup %962 }
 0x721   :  { %904 = vmatmul.mubr.f32.vlgmr.msra.gmra.mrb[20].mxu0 %v963_v45 }
 0x7f4   :  { %v604_v47 = vpop.f32.mrb[20].mxu0 }
 0x7f5   :  { %v605_v48 = vadd.f32 %v632_v46, %v604_v47  ;;  %v905_v49 = vpop.f32.mrb[21].mxu0 }
 0x7f7   :  { %608 = vst [vmem:[%s1277_s6] sm:$0xff] %v605_v48 }

</bundles_post_ra>
